<compile_context>
chip_gen: v5e
topology: v5e:2x2
jax: 0.10.0
libtpu: 0.0.40
codegen_flags: <defaults>
</compile_context>

<pallas_src>
import functools

import jax
import jax.numpy as jnp
from jax.experimental import pallas as pl
from jax.experimental.pallas import tpu as pltpu


def base_block_kernel(x_ref, w3_ref, bn_b_ref, w1_ref, b1_ref, out_ref,
                      cols_ref, *, H, W, compute_dtype):
    # x_ref    : (1, Cin, N)       one NCHW image, spatially flattened (N = H*W on lanes)
    # w3_ref   : (Cin, 9*Cin)      3x3 conv weight with BN scale folded in, tap-major columns
    # bn_b_ref : (Cin, 1)          folded BN bias
    # w1_ref   : (Cout, Cin)       1x1 conv weight
    # b1_ref   : (Cout, 1)         1x1 conv bias
    # out_ref  : (1, Cout, N)
    # cols_ref : (9*Cin, N)        f32 scratch: im2col operand
    Cin = x_ref.shape[1]
    N = H * W

    x = x_ref[0].astype(jnp.float32)                 # (Cin, N) f32

    # Border-validity masks: they implement the 3x3 "same" zero padding *and*
    # zero exactly the lanes where the circular roll below would wrap around the
    # flat image, so no halo'd / padded copy of the image is ever needed.
    lane = jax.lax.broadcasted_iota(jnp.int32, (Cin, N), 1)
    wcol = lane % W
    not_top = lane >= W                              # a row above exists
    not_bot = lane < N - W                           # a row below exists
    not_left = wcol > 0                              # a column to the left exists
    not_right = wcol < W - 1                         # a column to the right exists

    # Assemble the (9*Cin, N) im2col operand: tap t = ky*3 + kx is the image shifted
    # by (ky-1, kx-1).  tap[p] = x[p + s]  ==  roll(x, -s) on the lane axis (XLU).
    for ky in range(3):
        for kx in range(3):
            dy, dx = ky - 1, kx - 1
            s = dy * W + dx                          # flat lane shift of this tap
            tap = x if s == 0 else pltpu.roll(x, shift=(-s) % N, axis=1)
            mask = None
            if dy == -1:
                mask = not_top
            elif dy == 1:
                mask = not_bot
            if dx == -1:
                mask = not_left if mask is None else jnp.logical_and(mask, not_left)
            elif dx == 1:
                mask = not_right if mask is None else jnp.logical_and(mask, not_right)
            if mask is not None:
                tap = jnp.where(mask, tap, 0.0)
            t = ky * 3 + kx
            cols_ref[t * Cin:(t + 1) * Cin, :] = tap

    # 3x3 conv (+ folded BN scale) as a single lane-dense MXU matmul:
    # (Cin, 9*Cin) @ (9*Cin, N) -> (Cin, N), f32 accumulation.
    cols = cols_ref[...].astype(compute_dtype)
    conv = jnp.dot(w3_ref[...], cols, preferred_element_type=jnp.float32)

    # BN bias + SiLU (f32 elementwise, EUP sigmoid), then residual add.
    z = conv + bn_b_ref[...]
    z = z * jax.nn.sigmoid(z)
    y = x + z                                        # (Cin, N) f32

    # 1x1 conv + bias + sigmoid; (Cout, N) output is lane-dense and already NCHW-flat.
    o = jnp.dot(w1_ref[...], y.astype(compute_dtype),
                preferred_element_type=jnp.float32) + b1_ref[...]
    out_ref[0] = jax.nn.sigmoid(o).astype(out_ref.dtype)


def base_block_forward(x_nchw, w3_oihw, bn_gamma, bn_beta, bn_mean, bn_var,
                       w1_oihw, b1, eps=1e-3, compute_dtype=jnp.float32):
    """x_nchw: (B, Cin, H, W) -> (B, Cout, H, W) float32 (NCHW in, NCHW out).

    compute_dtype: dtype of the MXU matmul operands. jnp.float32 reproduces the
    PyTorch module's f32 numerics to 1e-4; jnp.bfloat16 is the v6e/v7x fast path
    (f32 accumulation and f32 elementwise math are kept in both cases).
    """
    B, Cin, H, W = x_nchw.shape
    Cout = w1_oihw.shape[0]
    N = H * W

    # Channels-first flat view: a pure reshape of NCHW (no transpose, no pad, no copy).
    x_flat = x_nchw.reshape(B, Cin, N).astype(jnp.float32)

    # Fold BatchNorm (inference) scale into the 3x3 weights; keep the bias separate.
    inv_std = 1.0 / jnp.sqrt(bn_var.astype(jnp.float32) + eps)
    bn_scale = bn_gamma.astype(jnp.float32) * inv_std                       # (Cin,)
    bn_bias = (bn_beta.astype(jnp.float32)
               - bn_mean.astype(jnp.float32) * bn_scale).reshape(Cin, 1)

    # OIHW -> (O, kh, kw, I) -> (O, 9*I): column block t = kh*3 + kw holds tap t.
    w3_flat = jnp.transpose(w3_oihw.astype(jnp.float32), (0, 2, 3, 1)).reshape(Cin, 9 * Cin)
    w3_k = (w3_flat * bn_scale[:, None]).astype(compute_dtype)              # (Cin, 9*Cin)
    w1_k = w1_oihw[:, :, 0, 0].astype(compute_dtype)                        # (Cout, Cin)
    b1_k = b1.reshape(Cout, 1).astype(jnp.float32)

    kernel = functools.partial(base_block_kernel, H=H, W=W, compute_dtype=compute_dtype)

    out_flat = pl.pallas_call(
        kernel,
        out_shape=jax.ShapeDtypeStruct((B, Cout, N), jnp.float32),
        grid_spec=pltpu.PrefetchScalarGridSpec(
            num_scalar_prefetch=0,
            grid=(B,),
            in_specs=[
                pl.BlockSpec((1, Cin, N), lambda b: (b, 0, 0)),
                pl.BlockSpec((Cin, 9 * Cin), lambda b: (0, 0)),
                pl.BlockSpec((Cin, 1), lambda b: (0, 0)),
                pl.BlockSpec((Cout, Cin), lambda b: (0, 0)),
                pl.BlockSpec((Cout, 1), lambda b: (0, 0)),
            ],
            out_specs=pl.BlockSpec((1, Cout, N), lambda b: (b, 0, 0)),
            scratch_shapes=[
                pltpu.VMEM((9 * Cin, N), jnp.float32),           # im2col operand
            ],
        ),
        compiler_params=pltpu.CompilerParams(
            dimension_semantics=("parallel",),
            # Tiny footprint here; cap scoped VMEM explicitly so the same kernel keeps
            # compiling when scaled to larger C/H/W on v7x (64 MiB VMEM per TC).
            vmem_limit_bytes=32 * 1024 * 1024,
        ),
    )(x_flat, w3_k, bn_bias, w1_k, b1_k)

    # Free reshape back to (B, Cout, H, W); output is already channels-first (NCHW).
    return out_flat.reshape(B, Cout, H, W)


def reference(x, w3, gamma, beta, mean, var, w1, b1, eps=1e-3):
    """Plain-JAX NCHW reference matching the PyTorch forward."""
    c1 = jax.lax.conv_general_dilated(
        x, w3, window_strides=(1, 1), padding="SAME",
        dimension_numbers=("NCHW", "OIHW", "NCHW"))
    c1 = (c1 - mean[None, :, None, None]) / jnp.sqrt(var[None, :, None, None] + eps)
    c1 = c1 * gamma[None, :, None, None] + beta[None, :, None, None]
    c1 = c1 * jax.nn.sigmoid(c1)          # SiLU
    y = x + c1
    c2 = jax.lax.conv_general_dilated(
        y, w1, window_strides=(1, 1), padding="VALID",
        dimension_numbers=("NCHW", "OIHW", "NCHW")) + b1[None, :, None, None]
    return jax.nn.sigmoid(c2)


if __name__ == "__main__":
    key = jax.random.PRNGKey(0)
    B, Cin, Cout, H, W = 2, 4, 8, 16, 16

    ks = jax.random.split(key, 8)
    x = jax.random.normal(ks[0], (B, Cin, H, W), jnp.float32)

    # Deterministic synthetic parameters (shapes as in base_block.__init__).
    w3 = jax.random.normal(ks[1], (Cin, Cin, 3, 3), jnp.float32) * 0.1   # BaseConv 3x3, no bias
    bn_gamma = 1.0 + 0.1 * jax.random.normal(ks[2], (Cin,), jnp.float32)
    bn_beta = 0.1 * jax.random.normal(ks[3], (Cin,), jnp.float32)
    bn_mean = 0.1 * jax.random.normal(ks[4], (Cin,), jnp.float32)
    bn_var = jax.nn.softplus(jax.random.normal(ks[5], (Cin,), jnp.float32)) + 0.5
    w1 = jax.random.normal(ks[6], (Cout, Cin, 1, 1), jnp.float32) * 0.1  # 1x1 conv, with bias
    b1 = 0.1 * jax.random.normal(ks[7], (Cout,), jnp.float32)

    ref = reference(x, w3, bn_gamma, bn_beta, bn_mean, bn_var, w1, b1)

    # f32 MXU operands: exact-semantics path, strict tolerance vs the f32 reference.
    out_f32 = base_block_forward(x, w3, bn_gamma, bn_beta, bn_mean, bn_var, w1, b1,
                                 compute_dtype=jnp.float32)
    out_f32 = jax.block_until_ready(out_f32)
    assert out_f32.shape == (B, Cout, H, W)
    assert jnp.allclose(out_f32, ref, atol=1e-4, rtol=1e-4), "f32 kernel mismatch vs reference"

    # bf16 MXU operands (v6e/v7x fast path), f32 accumulation + f32 elementwise epilogue.
    out_bf16 = base_block_forward(x, w3, bn_gamma, bn_beta, bn_mean, bn_var, w1, b1,
                                  compute_dtype=jnp.bfloat16)
    out_bf16 = jax.block_until_ready(out_bf16)
    assert jnp.allclose(out_bf16, ref, atol=5e-3, rtol=5e-3), "bf16 kernel mismatch vs reference"

    print("KERNEL_OK")
</pallas_src>

<mosaic_0001>
module attributes {stable_mosaic.version = 11 : i64} {
  func.func @base_block_kernel(%arg0: i32, %arg1: memref<1x4x256xf32, #tpu.memory_space<vmem>>, %arg2: memref<4x36xf32, #tpu.memory_space<vmem>>, %arg3: memref<4x1xf32, #tpu.memory_space<vmem>>, %arg4: memref<8x4xf32, #tpu.memory_space<vmem>>, %arg5: memref<8x1xf32, #tpu.memory_space<vmem>>, %arg6: memref<1x8x256xf32, #tpu.memory_space<vmem>>, %arg7: memref<36x256xf32, #tpu.memory_space<vmem>>) attributes {dimension_semantics = [#tpu.dimension_semantics<parallel>], iteration_bounds = array<i64: 2>, scalar_prefetch = 0 : i64, scratch_operands = 1 : i64, tpu.core_type = #tpu.core_type<tc>, window_params = [{transform_indices = @transform_0, window_bounds = array<i64: 1, 4, 256>}, {pipeline_mode = #tpu.pipeline_mode<synchronous>, transform_indices = @transform_1, window_bounds = array<i64: 4, 36>}, {pipeline_mode = #tpu.pipeline_mode<synchronous>, transform_indices = @transform_2, window_bounds = array<i64: 4, 1>}, {pipeline_mode = #tpu.pipeline_mode<synchronous>, transform_indices = @transform_3, window_bounds = array<i64: 8, 4>}, {pipeline_mode = #tpu.pipeline_mode<synchronous>, transform_indices = @transform_4, window_bounds = array<i64: 8, 1>}, {transform_indices = @transform_5, window_bounds = array<i64: 1, 8, 256>}]} {
    %c0 = arith.constant 0 : index
    %c0_0 = arith.constant 0 : index
    %c0_1 = arith.constant 0 : index
    %0 = vector.load %arg1[%c0, %c0_0, %c0_1] : memref<1x4x256xf32, #tpu.memory_space<vmem>>, vector<1x4x256xf32>
    %1 = vector.shape_cast %0 : vector<1x4x256xf32> to vector<4x256xf32>
    %2 = tpu.iota {dimensions = array<i32: 1>} : vector<4x256xi32>
    %c16_i32 = arith.constant 16 : i32
    %c0_i32 = arith.constant 0 : i32
    %3 = arith.cmpi eq, %c16_i32, %c0_i32 : i32
    %c1_i32 = arith.constant 1 : i32
    %4 = arith.select %3, %c1_i32, %c16_i32 : i32
    %5 = vector.broadcast %4 : i32 to vector<4x256xi32>
    %6 = arith.remsi %2, %5 : vector<4x256xi32>
    %c0_i32_2 = arith.constant 0 : i32
    %7 = vector.broadcast %c0_i32_2 : i32 to vector<4x256xi32>
    %8 = arith.cmpi ne, %6, %7 : vector<4x256xi32>
    %c0_i32_3 = arith.constant 0 : i32
    %9 = vector.broadcast %c0_i32_3 : i32 to vector<4x256xi32>
    %10 = arith.cmpi slt, %6, %9 : vector<4x256xi32>
    %c0_i32_4 = arith.constant 0 : i32
    %11 = arith.cmpi slt, %4, %c0_i32_4 : i32
    %12 = vector.broadcast %11 : i1 to vector<4x256xi1>
    %13 = vector.broadcast %12 : vector<4x256xi1> to vector<4x256xi1>
    %14 = arith.xori %10, %13 : vector<4x256xi1>
    %15 = arith.andi %14, %8 : vector<4x256xi1>
    %16 = vector.broadcast %4 : i32 to vector<4x256xi32>
    %17 = arith.addi %6, %16 : vector<4x256xi32>
    %18 = arith.select %15, %17, %6 : vector<4x256xi1>, vector<4x256xi32>
    %c16_i32_5 = arith.constant 16 : i32
    %19 = vector.broadcast %c16_i32_5 : i32 to vector<4x256xi32>
    %20 = arith.cmpi sge, %2, %19 : vector<4x256xi32>
    %c240_i32 = arith.constant 240 : i32
    %21 = vector.broadcast %c240_i32 : i32 to vector<4x256xi32>
    %22 = arith.cmpi slt, %2, %21 : vector<4x256xi32>
    %c0_i32_6 = arith.constant 0 : i32
    %23 = vector.broadcast %c0_i32_6 : i32 to vector<4x256xi32>
    %24 = arith.cmpi sgt, %18, %23 : vector<4x256xi32>
    %c15_i32 = arith.constant 15 : i32
    %25 = vector.broadcast %c15_i32 : i32 to vector<4x256xi32>
    %26 = arith.cmpi slt, %18, %25 : vector<4x256xi32>
    %c17_i32 = arith.constant 17 : i32
    %27 = tpu.dynamic_rotate %1 by %c17_i32 dim 1 : vector<4x256xf32>, i32 -> vector<4x256xf32>
    %28 = arith.andi %20, %24 : vector<4x256xi1>
    %cst = arith.constant 0.000000e+00 : f32
    %29 = vector.broadcast %cst : f32 to vector<4x256xf32>
    %30 = arith.select %28, %27, %29 : vector<4x256xi1>, vector<4x256xf32>
    %c0_7 = arith.constant 0 : index
    %c0_8 = arith.constant 0 : index
    %31 = vector.load %arg7[%c0_7, %c0_8] : memref<36x256xf32, #tpu.memory_space<vmem>>, vector<4x256xf32>
    tpu.vector_store %arg7[%c0_7, %c0_8], %30 {strides = array<i32>} : memref<36x256xf32, #tpu.memory_space<vmem>>, vector<4x256xf32>,
    %c16_i32_9 = arith.constant 16 : i32
    %32 = tpu.dynamic_rotate %1 by %c16_i32_9 dim 1 : vector<4x256xf32>, i32 -> vector<4x256xf32>
    %cst_10 = arith.constant 0.000000e+00 : f32
    %33 = vector.broadcast %cst_10 : f32 to vector<4x256xf32>
    %34 = arith.select %20, %32, %33 : vector<4x256xi1>, vector<4x256xf32>
    %c4 = arith.constant 4 : index
    %c0_11 = arith.constant 0 : index
    %35 = vector.load %arg7[%c4, %c0_11] : memref<36x256xf32, #tpu.memory_space<vmem>>, vector<4x256xf32>
    tpu.vector_store %arg7[%c4, %c0_11], %34 {strides = array<i32>} : memref<36x256xf32, #tpu.memory_space<vmem>>, vector<4x256xf32>,
    %c15_i32_12 = arith.constant 15 : i32
    %36 = tpu.dynamic_rotate %1 by %c15_i32_12 dim 1 : vector<4x256xf32>, i32 -> vector<4x256xf32>
    %37 = arith.andi %20, %26 : vector<4x256xi1>
    %cst_13 = arith.constant 0.000000e+00 : f32
    %38 = vector.broadcast %cst_13 : f32 to vector<4x256xf32>
    %39 = arith.select %37, %36, %38 : vector<4x256xi1>, vector<4x256xf32>
    %c8 = arith.constant 8 : index
    %c0_14 = arith.constant 0 : index
    %40 = vector.load %arg7[%c8, %c0_14] : memref<36x256xf32, #tpu.memory_space<vmem>>, vector<4x256xf32>
    tpu.vector_store %arg7[%c8, %c0_14], %39 {strides = array<i32>} : memref<36x256xf32, #tpu.memory_space<vmem>>, vector<4x256xf32>,
    %c1_i32_15 = arith.constant 1 : i32
    %41 = tpu.dynamic_rotate %1 by %c1_i32_15 dim 1 : vector<4x256xf32>, i32 -> vector<4x256xf32>
    %cst_16 = arith.constant 0.000000e+00 : f32
    %42 = vector.broadcast %cst_16 : f32 to vector<4x256xf32>
    %43 = arith.select %24, %41, %42 : vector<4x256xi1>, vector<4x256xf32>
    %c12 = arith.constant 12 : index
    %c0_17 = arith.constant 0 : index
    %44 = vector.load %arg7[%c12, %c0_17] : memref<36x256xf32, #tpu.memory_space<vmem>>, vector<4x256xf32>
    tpu.vector_store %arg7[%c12, %c0_17], %43 {strides = array<i32>} : memref<36x256xf32, #tpu.memory_space<vmem>>, vector<4x256xf32>,
    %c16 = arith.constant 16 : index
    %c0_18 = arith.constant 0 : index
    %45 = vector.load %arg7[%c16, %c0_18] : memref<36x256xf32, #tpu.memory_space<vmem>>, vector<4x256xf32>
    tpu.vector_store %arg7[%c16, %c0_18], %1 {strides = array<i32>} : memref<36x256xf32, #tpu.memory_space<vmem>>, vector<4x256xf32>,
    %c255_i32 = arith.constant 255 : i32
    %46 = tpu.dynamic_rotate %1 by %c255_i32 dim 1 : vector<4x256xf32>, i32 -> vector<4x256xf32>
    %cst_19 = arith.constant 0.000000e+00 : f32
    %47 = vector.broadcast %cst_19 : f32 to vector<4x256xf32>
    %48 = arith.select %26, %46, %47 : vector<4x256xi1>, vector<4x256xf32>
    %c20 = arith.constant 20 : index
    %c0_20 = arith.constant 0 : index
    %49 = vector.load %arg7[%c20, %c0_20] : memref<36x256xf32, #tpu.memory_space<vmem>>, vector<4x256xf32>
    tpu.vector_store %arg7[%c20, %c0_20], %48 {strides = array<i32>} : memref<36x256xf32, #tpu.memory_space<vmem>>, vector<4x256xf32>,
    %c241_i32 = arith.constant 241 : i32
    %50 = tpu.dynamic_rotate %1 by %c241_i32 dim 1 : vector<4x256xf32>, i32 -> vector<4x256xf32>
    %51 = arith.andi %22, %24 : vector<4x256xi1>
    %cst_21 = arith.constant 0.000000e+00 : f32
    %52 = vector.broadcast %cst_21 : f32 to vector<4x256xf32>
    %53 = arith.select %51, %50, %52 : vector<4x256xi1>, vector<4x256xf32>
    %c24 = arith.constant 24 : index
    %c0_22 = arith.constant 0 : index
    %54 = vector.load %arg7[%c24, %c0_22] : memref<36x256xf32, #tpu.memory_space<vmem>>, vector<4x256xf32>
    tpu.vector_store %arg7[%c24, %c0_22], %53 {strides = array<i32>} : memref<36x256xf32, #tpu.memory_space<vmem>>, vector<4x256xf32>,
    %c240_i32_23 = arith.constant 240 : i32
    %55 = tpu.dynamic_rotate %1 by %c240_i32_23 dim 1 : vector<4x256xf32>, i32 -> vector<4x256xf32>
    %cst_24 = arith.constant 0.000000e+00 : f32
    %56 = vector.broadcast %cst_24 : f32 to vector<4x256xf32>
    %57 = arith.select %22, %55, %56 : vector<4x256xi1>, vector<4x256xf32>
    %c28 = arith.constant 28 : index
    %c0_25 = arith.constant 0 : index
    %58 = vector.load %arg7[%c28, %c0_25] : memref<36x256xf32, #tpu.memory_space<vmem>>, vector<4x256xf32>
    tpu.vector_store %arg7[%c28, %c0_25], %57 {strides = array<i32>} : memref<36x256xf32, #tpu.memory_space<vmem>>, vector<4x256xf32>,
    %c239_i32 = arith.constant 239 : i32
    %59 = tpu.dynamic_rotate %1 by %c239_i32 dim 1 : vector<4x256xf32>, i32 -> vector<4x256xf32>
    %60 = arith.andi %22, %26 : vector<4x256xi1>
    %cst_26 = arith.constant 0.000000e+00 : f32
    %61 = vector.broadcast %cst_26 : f32 to vector<4x256xf32>
    %62 = arith.select %60, %59, %61 : vector<4x256xi1>, vector<4x256xf32>
    %c32 = arith.constant 32 : index
    %c0_27 = arith.constant 0 : index
    %63 = vector.load %arg7[%c32, %c0_27] : memref<36x256xf32, #tpu.memory_space<vmem>>, vector<4x256xf32>
    tpu.vector_store %arg7[%c32, %c0_27], %62 {strides = array<i32>} : memref<36x256xf32, #tpu.memory_space<vmem>>, vector<4x256xf32>,
    %c0_28 = arith.constant 0 : index
    %c0_29 = arith.constant 0 : index
    %64 = vector.load %arg7[%c0_28, %c0_29] : memref<36x256xf32, #tpu.memory_space<vmem>>, vector<36x256xf32>
    %c0_30 = arith.constant 0 : index
    %c0_31 = arith.constant 0 : index
    %65 = vector.load %arg2[%c0_30, %c0_31] : memref<4x36xf32, #tpu.memory_space<vmem>>, vector<4x36xf32>
    %cst_32 = arith.constant dense<0.000000e+00> : vector<4x256xf32>
    %66 = tpu.matmul %65, %64, %cst_32 {dimension_numbers = #tpu.dot_dimension_numbers<[1], [0], [0], [1], [0, 0, 1, 1], [], []>} : vector<4x36xf32>, vector<36x256xf32>, vector<4x256xf32> -> vector<4x256xf32>
    %c0_33 = arith.constant 0 : index
    %c0_34 = arith.constant 0 : index
    %67 = vector.load %arg3[%c0_33, %c0_34] : memref<4x1xf32, #tpu.memory_space<vmem>>, vector<4x1xf32>
    %68 = vector.broadcast %67 : vector<4x1xf32> to vector<4x256xf32>
    %69 = arith.addf %66, %68 : vector<4x256xf32>
    %70 = arith.negf %69 : vector<4x256xf32>
    %71 = math.exp %70 : vector<4x256xf32>
    %cst_35 = arith.constant 1.000000e+00 : f32
    %72 = vector.broadcast %cst_35 : f32 to vector<4x256xf32>
    %73 = arith.addf %72, %71 : vector<4x256xf32>
    %74 = arith.divf %72, %73 : vector<4x256xf32>
    %75 = arith.mulf %69, %74 : vector<4x256xf32>
    %76 = arith.addf %1, %75 : vector<4x256xf32>
    %c0_36 = arith.constant 0 : index
    %c0_37 = arith.constant 0 : index
    %77 = vector.load %arg4[%c0_36, %c0_37] : memref<8x4xf32, #tpu.memory_space<vmem>>, vector<8x4xf32>
    %cst_38 = arith.constant dense<0.000000e+00> : vector<8x256xf32>
    %78 = tpu.matmul %77, %76, %cst_38 {dimension_numbers = #tpu.dot_dimension_numbers<[1], [0], [0], [1], [0, 0, 1, 1], [], []>} : vector<8x4xf32>, vector<4x256xf32>, vector<8x256xf32> -> vector<8x256xf32>
    %c0_39 = arith.constant 0 : index
    %c0_40 = arith.constant 0 : index
    %79 = vector.load %arg5[%c0_39, %c0_40] : memref<8x1xf32, #tpu.memory_space<vmem>>, vector<8x1xf32>
    %80 = vector.broadcast %79 : vector<8x1xf32> to vector<8x256xf32>
    %81 = arith.addf %78, %80 : vector<8x256xf32>
    %82 = arith.negf %81 : vector<8x256xf32>
    %83 = math.exp %82 : vector<8x256xf32>
    %cst_41 = arith.constant 1.000000e+00 : f32
    %84 = vector.broadcast %cst_41 : f32 to vector<8x256xf32>
    %85 = arith.addf %84, %83 : vector<8x256xf32>
    %86 = arith.divf %84, %85 : vector<8x256xf32>
    %c0_42 = arith.constant 0 : index
    %c0_43 = arith.constant 0 : index
    %c0_44 = arith.constant 0 : index
    %87 = vector.load %arg6[%c0_42, %c0_43, %c0_44] : memref<1x8x256xf32, #tpu.memory_space<vmem>>, vector<1x8x256xf32>
    %88 = vector.shape_cast %87 : vector<1x8x256xf32> to vector<8x256xf32>
    %89 = vector.shape_cast %86 : vector<8x256xf32> to vector<1x8x256xf32>
    tpu.vector_store %arg6[%c0_42, %c0_43, %c0_44], %89 {strides = array<i32>} : memref<1x8x256xf32, #tpu.memory_space<vmem>>, vector<1x8x256xf32>,
    return
  }
  func.func @transform_0(%arg0: i32) -> (i32, i32, i32) {
    %c0_i32 = arith.constant 0 : i32
    %c0_i32_0 = arith.constant 0 : i32
    %c0_i32_1 = arith.constant 0 : i32
    return %arg0, %c0_i32, %c0_i32_0 : i32, i32, i32
  }
  func.func @transform_1(%arg0: i32) -> (i32, i32) {
    %c0_i32 = arith.constant 0 : i32
    %c0_i32_0 = arith.constant 0 : i32
    %c0_i32_1 = arith.constant 0 : i32
    return %c0_i32, %c0_i32_0 : i32, i32
  }
  func.func @transform_2(%arg0: i32) -> (i32, i32) {
    %c0_i32 = arith.constant 0 : i32
    %c0_i32_0 = arith.constant 0 : i32
    %c0_i32_1 = arith.constant 0 : i32
    return %c0_i32, %c0_i32_0 : i32, i32
  }
  func.func @transform_3(%arg0: i32) -> (i32, i32) {
    %c0_i32 = arith.constant 0 : i32
    %c0_i32_0 = arith.constant 0 : i32
    %c0_i32_1 = arith.constant 0 : i32
    return %c0_i32, %c0_i32_0 : i32, i32
  }
  func.func @transform_4(%arg0: i32) -> (i32, i32) {
    %c0_i32 = arith.constant 0 : i32
    %c0_i32_0 = arith.constant 0 : i32
    %c0_i32_1 = arith.constant 0 : i32
    return %c0_i32, %c0_i32_0 : i32, i32
  }
  func.func @transform_5(%arg0: i32) -> (i32, i32, i32) {
    %c0_i32 = arith.constant 0 : i32
    %c0_i32_0 = arith.constant 0 : i32
    %c0_i32_1 = arith.constant 0 : i32
    return %arg0, %c0_i32, %c0_i32_0 : i32, i32, i32
  }
}

</mosaic_0001>

<bundles_post_ra>
// kernel: tpu_custom_call.1
= control target key start
LH: loop header
LB: loop body
LE: loop exit
PB: predicated region body
PF: predicated region fallthrough
CT: control target
= control target key end

     0   :  { %10 = vsyncpa [#allocation4], 0  ;;  %s1105_s0 = inlined_call_operand.vmem [shape: f32[2,4,256], index: 0, kind: input, shape index: {}]   ;;  %s1106_s1 = inlined_call_operand.vmem [shape: f32[4,36], index: 1, kind: input, shape index: {}]   ;;  %s1107_s2 = inlined_call_operand.vmem [shape: f32[4,1], index: 2, kind: input, shape index: {}]   ;;  %s1108_s3 = inlined_call_operand.vmem [shape: f32[8,4], index: 3, kind: input, shape index: {}]   ;;  %s1109_s4 = inlined_call_operand.vmem [shape: f32[8,1], index: 4, kind: input, shape index: {}]   ;;  %s1110_s5 = inlined_call_operand.hbm [shape: f32[2,8,256], index: 5, kind: output, shape index: {}]  }
   0x1   :  { %12 = vsyncpa [#allocation4 + $0x1], 0  ;;  %s912_s18 = smov 0   ;;  %s914_s19 = smov 0  }
   0x2   :  { %s916_s20 = smov 0   ;;  %s918_s21 = smov 0  }
   0x3 LB: > { %s933_s22 = sadd.s32 4294967295, %s871_s21   ;;  %s716_s23 = sadd.s32 4294967294, %s871_s21   ;;  %s871_s21 = sphi %s918_s21, %s1124_s21   ;;  %s867_s20 = sphi %s916_s20, %s1123_s20   ;;  %s863_s19 = sphi %s914_s19, %s1122_s19   ;;  %s859_s18 = sphi %s912_s18, %s1121_s18  }
   0x4   : > { %s937_s24 = sadd.s32 1, %s871_s21   ;;  %s135_s25 = sadd.s32 1, %s867_s20 }
   0x5   : > { %s132_s26 = ssub.s32 %s871_s21, %s937_s24  ;;  %p145_p0 = scmp.ne.s32.totalorder %s867_s20, %s863_s19 }
   0x6   : > { %p133_p1 = scmp.eq.s32.totalorder %s132_s26, 0  ;;  %p146_p2 = scmp.eq.s32.totalorder %s933_s22, 1 }
   0x7   : > { %p151_p3 = scmp.ne.s32.totalorder %s863_s19, %s859_s18  ;;  %p152_p4 = scmp.eq.s32.totalorder %s716_s23, 1 }
   0x8   : > { %s948_s27 = scalar_select %p133_p1, %s867_s20, %s135_s25  }
   0x9   : > { %p950_p5 = por %p146_p2, %p145_p0  ;;  %p954_p6 = por %p152_p4, %p151_p3 }
   0xa   : > { %p719_p7 = scmp.ge.s32.totalorder %s871_s21, 1  ;;  %p190_p8 = scmp.lt.s32.totalorder %s871_s21, 3 }
   0xc   : > { %p191_p9 = pnand %p719_p7, %p190_p8 }
   0xd   : > { %p218_p10 = scmp.lt.s32.totalorder (!%p191_p9), %s933_s22, 1  ;;  %s873_s10 = smov (!%p191_p9), 16  }
   0xe   : > { %194 = sbr.rel (%p191_p9) target bundleno = 577 (0x241), region = 40  ;;  %s874_s11 = smov (!%p191_p9), 15  }
   0xf   : > { %s875_s12 = smov (!%p191_p9), 1   ;;  %s876_s13 = smov (!%p191_p9), 127  }
  0x10   : > { %s877_s14 = smov (!%p191_p9), 113   ;;  %s878_s15 = smov (!%p191_p9), 112  }
  0x11   : > { %s879_s16 = smov (!%p191_p9), 17   ;;  %s880_s17 = smov (!%p191_p9), 111  }
  0x12   : > { %s829_s7 = scalar_lea.hbm (!%p191_p9), %s1110_s5, 32 }
  0x13   : > { %s219_s30 = scalar_select %p218_p10, %s933_s22, 1  ;;  %v224_v19 = vlaneseq  ;;  %v438_v58 = vld [vmem:[%s1107_s2] sm:$0xf]  ;;  %v881_v59 = vmov 0  }
  0x14   : > { %790 = vset.pattern.permute.xlu1 %v881_v59  ;;  %791 = vset.pattern.permute.xlu2 %v881_v59 }
  0x15   : > { %s740_s6 = sshll.u32 %s219_s30, 3  ;;  %v978_v20 = vand.u32 127, %v224_v19  ;;  %792 = vset.pattern.permute.xlu0 %v881_v59 }
  0x16   : > { %s222_s9 = scalar_lea.vmem %s1105_s0, %s740_s6 }
  0x17   : > { %v965_v0 = vld [vmem:[%s222_s9] sm:$0xff]  ;;  %v231_v22 = vand.u32 15, %v978_v20  ;;  %v982_v23 = vadd.s32 128, %v978_v20  ;;  %vm251_vm0 = vcmp.ge.s32.totalorder %v978_v20, 16  ;;  %vm309_vm2 = vcmp.lt.s32.totalorder %v978_v20, 15 }
  0x18   : > { %260 = vst [vmem:[#allocation1] ss:$2 sm:$0xff] %v965_v0  ;;  %vm327_vm5 = vcmp.lt.s32.totalorder %v978_v20, 1  ;;  %vm356_vm8 = vcmp.lt.s32.totalorder %v978_v20, 127  ;;  %vm378_vm10 = vcmp.lt.s32.totalorder %v978_v20, 113  ;;  %vm396_vm12 = vcmp.lt.s32.totalorder %v978_v20, 112 }
  0x19   : > { %vm985_vm1 = vcmp.lt.s32.totalorder %v231_v22, 15  ;;  %v238_v25 = vand.u32 15, %v982_v23  ;;  %vm1004_vm6 = vcmp.gt.s32.totalorder %v231_v22, 0  ;;  %vm254_vm9 = vcmp.lt.s32.totalorder %v982_v23, 240 }
  0x1a   : > { %vm312_vm4 = vmand %vm251_vm0, %vm985_vm1  ;;  %vm418_vm13 = vcmp.lt.s32.totalorder %v978_v20, 111  ;;  %vm269_vm15 = vcmp.lt.s32.totalorder %v978_v20, 17 }
  0x1b   : > { %vm993_vm3 = vcmp.lt.s32.totalorder %v238_v25, 15  ;;  %vm1008_vm7 = vcmp.gt.s32.totalorder %v238_v25, 0 }
  0x1c   : > { %vm382_vm11 = vmand %vm254_vm9, %vm1008_vm7 }
  0x1d   : > { %vm422_vm14 = vmand %vm254_vm9, %vm993_vm3 }
  0x1f   : > { %v261_v1 = vld.sshfl [vmem:[#allocation1] sm:$0xff pattern:$0x75316420]  ;;  %v262_v2 = vld.sshfl [vmem:[#allocation1 + $0x8] sm:$0xff pattern:$0x75316420] }
  0x20   : > { %278 = vst [vmem:[#allocation1] ss:$2 sm:$0xff] %v965_v0 }
  0x27   : > { %v279_v3 = vld.sshfl [vmem:[#allocation1] sm:$0xff pattern:$0x75316420]  ;;  %v280_v4 = vld.sshfl [vmem:[#allocation1 + $0x8] sm:$0xff pattern:$0x75316420] }
  0x28   : > { %283 = vrot.lane.b32.xlu0 %v279_v3, %s873_s10  ;;  %300 = vst [vmem:[#allocation1] ss:$2 sm:$0xff] %v965_v0 }
  0x2f   : > { %v301_v5 = vld.sshfl [vmem:[#allocation1] sm:$0xff pattern:$0x75316420]  ;;  %v302_v6 = vld.sshfl [vmem:[#allocation1 + $0x8] sm:$0xff pattern:$0x75316420] }
  0x30   : > { %318 = vst [vmem:[#allocation1] ss:$2 sm:$0xff] %v965_v0  ;;  %305 = vrot.lane.b32.xlu1 %v301_v5, %s874_s11  ;;  %307 = vrot.lane.b32.xlu2 %v302_v6, %s874_s11 }
  0x37   : > { %v320_v7 = vld.sshfl [vmem:[#allocation1 + $0x8] sm:$0xff pattern:$0x75316420]  ;;  %v319_v8 = vld.sshfl [vmem:[#allocation1] sm:$0xff pattern:$0x75316420] }
  0x38   : > { %325 = vrot.lane.b32.xlu0 %v320_v7, %s875_s12  ;;  %340 = vst [vmem:[#allocation1] ss:$2 sm:$0xff] %v965_v0  ;;  %323 = vrot.lane.b32.xlu2 %v319_v8, %s875_s12  ;;  %s741_s12 = sshll.u32 %s933_s22, 4 }
  0x3f   : > { %v341_v9 = vld.sshfl [vmem:[#allocation1] sm:$0xff pattern:$0x75316420]  ;;  %v342_v10 = vld.sshfl [vmem:[#allocation1 + $0x8] sm:$0xff pattern:$0x75316420] }
  0x40   : > { %347 = vst [vmem:[#allocation1] ss:$2 sm:$0xff] %v965_v0 }
  0x41   : > { %345 = vst [vmem:[#allocation2 + $0x48] sm:$0xf] %v341_v9 }
  0x42   : > { %346 = vst [vmem:[#allocation2 + $0x28] sm:$0xf] %v342_v10 }
  0x47   : > { %v348_v11 = vld.sshfl [vmem:[#allocation1] sm:$0xff pattern:$0x75316420]  ;;  %v349_v12 = vld.sshfl [vmem:[#allocation1 + $0x8] sm:$0xff pattern:$0x75316420] }
  0x48   : > { %369 = vst [vmem:[#allocation1] ss:$2 sm:$0xff] %v965_v0  ;;  %352 = vrot.lane.b32.xlu2 %v348_v11, %s876_s13 }
  0x4f   : > { %v370_v13 = vld.sshfl [vmem:[#allocation1] sm:$0xff pattern:$0x75316420]  ;;  %v371_v14 = vld.sshfl [vmem:[#allocation1 + $0x8] sm:$0xff pattern:$0x75316420] }
  0x50   : > { %374 = vrot.lane.b32.xlu0 %v370_v13, %s877_s14  ;;  %376 = vrot.lane.b32.xlu1 %v371_v14, %s877_s14  ;;  %387 = vst [vmem:[#allocation1] ss:$2 sm:$0xff] %v965_v0 }
  0x51   : > { %354 = vrot.lane.b32.xlu2 %v349_v12, %s876_s13 }
  0x57   : > { %v388_v15 = vld.sshfl [vmem:[#allocation1] sm:$0xff pattern:$0x75316420]  ;;  %v389_v16 = vld.sshfl [vmem:[#allocation1 + $0x8] sm:$0xff pattern:$0x75316420] }
  0x58   : > { %392 = vrot.lane.b32.xlu0 %v388_v15, %s878_s15  ;;  %409 = vst [vmem:[#allocation1] ss:$2 sm:$0xff] %v965_v0 }
  0x59   : > { %265 = vrot.lane.b32.xlu2 %v261_v1, %s879_s16 }
  0x5f   : > { %v410_v17 = vld.sshfl [vmem:[#allocation1] sm:$0xff pattern:$0x75316420]  ;;  %v411_v18 = vld.sshfl [vmem:[#allocation1 + $0x8] sm:$0xff pattern:$0x75316420] }
  0x60   : > { %394 = vrot.lane.b32.xlu0 %v389_v16, %s878_s15  ;;  %414 = vrot.lane.b32.xlu1 %v410_v17, %s880_s17  ;;  %s652_s15 = scalar_lea.hbm %s1110_s5, %s741_s12 }
  0x61   : > { %s656_s22 = sshll.u32 %s652_s15, 4  ;;  %s657_s22 = int_to_ptr.hbm [resolvable:$true] %s656_s22 }
  0x62   : > { %s823_s25 = sshra.s32 %s657_s22, 4  ;;  %s824_s25 = int_to_ptr.hbm [resolvable:$true] %s823_s25 }
  0x63   : > { %s825_s26 = scalar_lea.hbm %s824_s25, 16  ;;  %p830_p0 = scmp.lt.s32.totalorder %s824_s25, %s1110_s5 }
  0x64   : > { %p826_p11 = scmp.ne.s32.totalorder %s824_s25, %s825_s26  ;;  %p831_p1 = scmp.lt.s32.totalorder %s829_s7, %s825_s26 }
  0x66   : > { %p827_p12 = pnand %p826_p11, %p950_p5  ;;  %p832_p2 = por %p831_p1, %p830_p0 }
  0x68   : > { %416 = vrot.lane.b32.xlu1 %v411_v18, %s880_s17  ;;  %267 = vrot.lane.b32.xlu0 %v262_v2, %s879_s16  ;;  %p828_p13 = pneg %p827_p12 }
  0x6a   : > { %p833_p3 = pnand %p832_p2, %p828_p13 }
  0x70   : > { %285 = vrot.lane.b32.xlu1 %v280_v4, %s873_s10  ;;  %s215_s10 = sand.u32 1, %s863_s19  }
  0x71   : > { %s720_s11 = sshll.u32 %s215_s10, 4  ;;  %s641_s23 = scalar_lea.sflag [#allocation4], %s215_s10 }
  0x72   : > { %s217_s16 = scalar_lea.vmem [#allocation3], %s720_s11 }
  0x73   : > { %s654_s17 = sshll.u32 %s217_s16, 4  ;;  %s655_s17 = int_to_ptr.vmem [resolvable:$true] %s654_s17 }
  0x78   : > { %441 = vperm.xlu1 %790, %v438_v58  }
  0x8a   : > { %v308_v21 = vpop.permute.xlu2 %307 }
  0x92   : > { %v324_v28 = vpop.permute.xlu2 %323 }
  0x9a   : > { %v990_v26 = vpop.permute.xlu0 %283 }
  0xa2   : > { %v306_v29 = vpop.permute.xlu1 %305  ;;  %v353_v37 = vpop.permute.xlu2 %352 }
  0xa3   : > { %v310_v30 = vsel %vm309_vm2, %v306_v29, %v308_v21  ;;  %v311_v31 = vsel %vm309_vm2, %v308_v21, %v306_v29  ;;  %vm272_vm2 = vmand %vm251_vm0, %vm1004_vm6  ;;  %v437_v29 = vld [vmem:[%s1106_s1] sm:$0xf] }
  0xa4   : > { %v314_v32 = vsel %vm312_vm4, %v311_v31, 0.0  ;;  %v315_v33 = vsel %vm993_vm3, %v310_v30, 0.0  ;;  %vm448_vm4 = vcmask 1043456  }
  0xa5   : > { %316 = vst [vmem:[#allocation2 + $0x18] sm:$0xf] %v314_v32 }
  0xa6   : > { %317 = vst [vmem:[#allocation2 + $0x10] sm:$0xf] %v315_v33 }
  0xaa   : > { %v326_v36 = vpop.permute.xlu0 %325 }
  0xab   : > { %v328_v38 = vsel %vm327_vm5, %v324_v28, %v326_v36  ;;  %v329_v39 = vsel %vm327_vm5, %v326_v36, %v324_v28  ;;  %v355_v44 = vpop.permute.xlu2 %354 }
  0xac   : > { %v330_v40 = vsel %vm1004_vm6, %v329_v39, 0.0  ;;  %v331_v41 = vsel %vm1008_vm7, %v328_v38, 0.0  ;;  %v357_v45 = vsel %vm356_vm8, %v353_v37, %v355_v44  ;;  %v358_v46 = vsel %vm356_vm8, %v355_v44, %v353_v37 }
  0xad   : > { %v334_v42 = vrot.slane %v330_v40, 4  ;;  %v335_v43 = vrot.slane %v331_v41, 4  ;;  %v359_v47 = vsel %vm985_vm1, %v357_v45, 0.0  ;;  %v360_v48 = vsel %vm993_vm3, %v358_v46, 0.0 }
  0xae   : > { %v363_v49 = vrot.slane %v359_v47, 4  ;;  %v364_v50 = vrot.slane %v360_v48, 4  ;;  %vm287_vm3 = vcmp.lt.s32.totalorder %v978_v20, 16 }
  0xaf   : > { %338 = vst [vmem:[#allocation2 + $0x18] sm:$0xf0] %v334_v42 }
  0xb0   : > { %339 = vst [vmem:[#allocation2 + $0x10] sm:$0xf0] %v335_v43  ;;  %v542_v43 = vld [vmem:[%s1109_s4] sm:$0xff] }
  0xb1   : > { %367 = vst [vmem:[#allocation2 + $0x48] sm:$0xf0] %v363_v49  ;;  %545 = vperm.xlu2 %791, %v542_v43  }
  0xb2   : > { %368 = vst [vmem:[#allocation2 + $0x28] sm:$0xf0] %v364_v50 }
  0xb3   : > { %v266_v4 = vpop.permute.xlu2 %265 }
  0xb6   : > { %v429_v20 = vld [vmem:[#allocation2 + $0x18] sm:$0xff] }
  0xb7   : > { %v430_v28 = vld [vmem:[#allocation2 + $0x10] sm:$0xff] }
  0xb8   : > { %v431_v27 = vld [vmem:[#allocation2 + $0x48] sm:$0xff] }
  0xc2   : > { %v375_v51 = vpop.permute.xlu0 %374  ;;  %v377_v52 = vpop.permute.xlu1 %376 }
  0xc3   : > { %v379_v53 = vsel %vm378_vm10, %v375_v51, %v377_v52  ;;  %v380_v54 = vsel %vm378_vm10, %v377_v52, %v375_v51 }
  0xc4   : > { %v383_v55 = vsel %vm1004_vm6, %v379_v53, 0.0  ;;  %v384_v56 = vsel %vm382_vm11, %v380_v54, 0.0 }
  0xc5   : > { %385 = vst [vmem:[#allocation2 + $0x8] sm:$0xf] %v383_v55 }
  0xc6   : > { %386 = vst [vmem:[#allocation2 + $0x20] sm:$0xf] %v384_v56 }
  0xca   : > { %v393_v57 = vpop.permute.xlu0 %392 }
  0xd2   : > { %v395_v60 = vpop.permute.xlu0 %394  ;;  %v415_v61 = vpop.permute.xlu1 %414 }
  0xd3   : > { %v397_v62 = vsel %vm396_vm12, %v393_v57, %v395_v60  ;;  %v398_v63 = vsel %vm396_vm12, %v395_v60, %v393_v57  ;;  %vm552_vm12 = vcmask 31744  }
  0xd4   : > { %v400_v1 = vsel %vm254_vm9, %v398_v63, 0.0  ;;  %v403_v2 = vrot.slane %v397_v62, 4 }
  0xd5   : > { %v404_v3 = vrot.slane %v400_v1, 4 }
  0xd6   : > { %407 = vst [vmem:[#allocation2 + $0x8] sm:$0xf0] %v403_v2 }
  0xd7   : > { %408 = vst [vmem:[#allocation2 + $0x20] sm:$0xf0] %v404_v3 }
  0xda   : > { %v417_v5 = vpop.permute.xlu1 %416  ;;  %v268_v6 = vpop.permute.xlu0 %267 }
  0xdb   : > { %v419_v7 = vsel %vm418_vm13, %v415_v61, %v417_v5  ;;  %v420_v8 = vsel %vm418_vm13, %v417_v5, %v415_v61  ;;  %v270_v9 = vsel %vm269_vm15, %v266_v4, %v268_v6  ;;  %v271_v10 = vsel %vm269_vm15, %v268_v6, %v266_v4  ;;  %v541_v6 = vld [vmem:[%s1108_s3] sm:$0xff] }
  0xdc   : > { %v423_v11 = vsel %vm985_vm1, %v419_v7, 0.0  ;;  %v424_v12 = vsel %vm422_vm14, %v420_v8, 0.0  ;;  %v274_v13 = vsel %vm272_vm2, %v271_v10, 0.0  ;;  %v275_v14 = vsel %vm1008_vm7, %v270_v9, 0.0 }
  0xdd   : > { %425 = vst [vmem:[#allocation2 + $0x40] sm:$0xf] %v423_v11  ;;  %v433_v24 = vld [vmem:[#allocation2 + $0x8] sm:$0xff] }
  0xde   : > { %426 = vst [vmem:[#allocation2 + $0x38] sm:$0xf] %v424_v12  ;;  %v434_v25 = vld [vmem:[#allocation2 + $0x20] sm:$0xff] }
  0xdf   : > { %276 = vst [vmem:[#allocation2 + $0x30] sm:$0xf] %v274_v13 }
  0xe0   : > { %277 = vst [vmem:[#allocation2] sm:$0xf] %v275_v14 }
  0xe2   : > { %v286_v15 = vpop.permute.xlu1 %285 }
  0xe3   : > { %v288_v16 = vsel %vm287_vm3, %v990_v26, %v286_v15  ;;  %v289_v17 = vsel %vm287_vm3, %v286_v15, %v990_v26  ;;  %v432_v26 = vld [vmem:[#allocation2 + $0x28] sm:$0xff] }
  0xe4   : > { %v290_v18 = vsel %vm251_vm0, %v289_v17, 0.0  ;;  %v295_v19 = vrot.slane %v288_v16, 4  ;;  %v435_v21 = vld [vmem:[#allocation2 + $0x40] sm:$0xf]  ;;  %vm444_vm0 = vcmask 293888  }
  0xe5   : > { %v294_v22 = vrot.slane %v290_v18, 4  ;;  %723 = vmatpush.msk.msra.mxu0 %vm448_vm4, %v435_v21  ;;  %v436_v23 = vld [vmem:[#allocation2 + $0x38] sm:$0xf] }
  0xe6   : > { %299 = vst [vmem:[#allocation2] sm:$0xf0] %v295_v19  ;;  %725 = vmatpush.msk.msra.mxu1 %vm448_vm4, %v436_v23 }
  0xe7   : > { %298 = vst [vmem:[#allocation2 + $0x30] sm:$0xf0] %v294_v22  ;;  %467 = vmatpush.msra.mxu0 %v433_v24 }
  0xe8   : > { %487 = vmatpush.msra.mxu1 %v434_v25 }
  0xe9   : > { %468 = vmatpush.msra.mxu0 %v431_v27 }
  0xea   : > { %488 = vmatpush.msra.mxu1 %v432_v26  ;;  %v442_v32 = vpop.permute.xlu1 %441 }
  0xeb   : > { %469 = vmatpush.msra.mxu0 %v429_v20 }
  0xec   : > { %489 = vmatpush.msra.mxu1 %v430_v28 }
  0xed   : > { %v428_v30 = vld [vmem:[#allocation2] sm:$0xff] }
  0xee   : > { %490 = vmatpush.msra.mxu1 %v428_v30  ;;  %v427_v31 = vld [vmem:[#allocation2 + $0x30] sm:$0xff] }
  0xef   : > { %470 = vmatpush.msra.mxu0 %v427_v31  ;;  %726 = vmatmul.msk.f32.vlgmr.msra.gmra.mxu1 %vm444_vm0, %v437_v29 }
  0xf0   : > { %724 = vmatmul.msk.f32.vlgmr.msra.gmra.mxu0 %vm444_vm0, %v437_v29 }
 0x10b   : > { %v546_v9 = vpop.permute.xlu2 %545 }
 0x16c   : > { %v492_v33 = vpop.f32.mrf.mxu1 }
 0x16d   : > { %v493_v34 = vadd.f32 %v492_v33, %v442_v32  ;;  %v472_v35 = vpop.f32.mrf.mxu0 }
 0x16e   : > { %v473_v36 = vadd.f32 %v472_v35, %v442_v32 }
 0x16f   : > { %v728_v37 = vmul.f32 -1.442695, %v493_v34 }
 0x170   : > { %v727_v38 = vmul.f32 -1.442695, %v473_v36 }
 0x171   : > { %793 = vpow2.f32 %v728_v37 }
 0x172   : > { %795 = vpow2.f32 %v727_v38 }
 0x177   : > { %v794_v39 = vpop.eup %793 }
 0x178   : > { %v796_v40 = vpop.eup %795  ;;  %v502_v41 = vadd.f32 1.0, %v794_v39 }
 0x179   : > { %v501_v42 = vadd.f32 1.0, %v796_v40 }
 0x17a   : > { %797 = vrcp.f32 %v502_v41  ;;  %v529_v49 = vand.u32 2147483648, %v502_v41  ;;  %v527_v52 = vand.u32 2147483647, %v502_v41  ;;  %vm523_vm6 = vweird.f32 %v502_v41 }
 0x17b   : > { %799 = vrcp.f32 %v501_v42  ;;  %v514_v53 = vand.u32 2147483648, %v501_v42  ;;  %v512_v55 = vand.u32 2147483647, %v501_v42  ;;  %vm508_vm8 = vweird.f32 %v501_v42 }
 0x17c   : > { %v530_v57 = vor.u32 1.1754944e-38, %v529_v49  ;;  %vm528_vm9 = vcmp.eq.f32.partialorder %v527_v52, 8.507059e+37 }
 0x17d   : > { %v515_v60 = vor.u32 1.1754944e-38, %v514_v53  ;;  %vm513_vm11 = vcmp.eq.f32.partialorder %v512_v55, 8.507059e+37 }
 0x180   : > { %v798_v44 = vpop.eup %797 }
 0x181   : > { %v800_v45 = vpop.eup %799  ;;  %v519_v46 = vmul.f32 %v798_v44, %v502_v41  ;;  %vm524_vm1 = vweird.f32 %v798_v44 }
 0x182   : > { %v504_v47 = vmul.f32 %v800_v45, %v501_v42  ;;  %vm509_vm5 = vweird.f32 %v800_v45  ;;  %vm525_vm7 = vmor %vm523_vm6, %vm524_vm1 }
 0x183   : > { %v520_v48 = vsub.f32 1.0, %v519_v46  ;;  %vm510_vm10 = vmor %vm508_vm8, %vm509_vm5 }
 0x184   : > { %v505_v50 = vsub.f32 1.0, %v504_v47 }
 0x185   : > { %v521_v51 = vmul.f32 %v798_v44, %v520_v48 }
 0x186   : > { %v506_v54 = vmul.f32 %v800_v45, %v505_v50 }
 0x187   : > { %v522_v56 = vadd.f32 %v798_v44, %v521_v51 }
 0x188   : > { %v507_v58 = vadd.f32 %v800_v45, %v506_v54 }
 0x189   : > { %v526_v59 = vsel %vm525_vm7, %v798_v44, %v522_v56 }
 0x18a   : > { %v531_v61 = vsel %vm528_vm9, %v530_v57, %v526_v59  ;;  %v511_v62 = vsel %vm510_vm10, %v800_v45, %v507_v58 }
 0x18b   : > { %v534_v63 = vmul.f32 %v531_v61, %v493_v34  ;;  %v516_v1 = vsel %vm513_vm11, %v515_v60, %v511_v62 }
 0x18c   : > { %v533_v2 = vmul.f32 %v516_v1, %v473_v36 }
 0x18d   : > { %v537_v3 = vrot.slane %v534_v63, 4 }
 0x18f   : > { %v538_v4 = vsel %vm448_vm4, %v533_v2, %v537_v3 }
 0x190   : > { %v540_v5 = vadd.f32 %v538_v4, %v965_v0 }
 0x192   : > { %549 = vst [vmem:[#allocation1] ss:$2 sm:$0xff] %v540_v5 }
 0x199   : > { %v550_v7 = vld.sshfl [vmem:[#allocation1] sm:$0xff pattern:$0x75316420]  ;;  %v551_v8 = vld.sshfl [vmem:[#allocation1 + $0x8] sm:$0xff pattern:$0x75316420] }
 0x19a   : > { %729 = vmatpush.msk.msra.mxu2 %vm448_vm4, %v550_v7  ;;  %731 = vmatpush.msk.msra.mxu3 %vm448_vm4, %v551_v8 }
 0x19b   : > { %730 = vmatmul.msk.f32.vlgmr.msra.gmra.mxu2 %vm552_vm12, %v541_v6  ;;  %732 = vmatmul.msk.f32.vlgmr.msra.gmra.mxu3 %vm552_vm12, %v541_v6 }
 0x21e   : > { %v577_v10 = vpop.f32.mrf.mxu2  ;;  %v597_v11 = vpop.f32.mrf.mxu3 }
 0x21f   : > { %v578_v12 = vadd.f32 %v577_v10, %v546_v9  ;;  %v598_v0 = vadd.f32 %v597_v11, %v546_v9 }
 0x221   : > { %v733_v13 = vmul.f32 -1.442695, %v578_v12  ;;  %v734_v14 = vmul.f32 -1.442695, %v598_v0 }
 0x223   : > { %801 = vpow2.f32 %v733_v13 }
 0x224   : > { %803 = vpow2.f32 %v734_v14 }
 0x229   : > { %v802_v15 = vpop.eup %801 }
 0x22a   : > { %v804_v16 = vpop.eup %803  ;;  %v606_v17 = vadd.f32 1.0, %v802_v15 }
 0x22b   : > { %v607_v18 = vadd.f32 1.0, %v804_v16 }
 0x22c   : > { %805 = vrcp.f32 %v606_v17  ;;  %v619_v27 = vand.u32 2147483648, %v606_v17  ;;  %v617_v20 = vand.u32 2147483647, %v606_v17  ;;  %vm613_vm15 = vweird.f32 %v606_v17 }
 0x22d   : > { %807 = vrcp.f32 %v607_v18  ;;  %v634_v28 = vand.u32 2147483648, %v607_v18  ;;  %v632_v30 = vand.u32 2147483647, %v607_v18  ;;  %vm628_vm3 = vweird.f32 %v607_v18 }
 0x22e   : > { %v620_v32 = vor.u32 1.1754944e-38, %v619_v27  ;;  %vm618_vm4 = vcmp.eq.f32.partialorder %v617_v20, 8.507059e+37 }
 0x22f   : > { %v635_v35 = vor.u32 1.1754944e-38, %v634_v28  ;;  %vm633_vm1 = vcmp.eq.f32.partialorder %v632_v30, 8.507059e+37 }
 0x232   : > { %v806_v19 = vpop.eup %805 }
 0x233   : > { %v808_v21 = vpop.eup %807  ;;  %v609_v22 = vmul.f32 %v806_v19, %v606_v17  ;;  %vm614_vm13 = vweird.f32 %v806_v19 }
 0x234   : > { %v624_v23 = vmul.f32 %v808_v21, %v607_v18  ;;  %vm629_vm14 = vweird.f32 %v808_v21  ;;  %vm615_vm2 = vmor %vm613_vm15, %vm614_vm13 }
 0x235   : > { %v610_v24 = vsub.f32 1.0, %v609_v22  ;;  %vm630_vm0 = vmor %vm628_vm3, %vm629_vm14 }
 0x236   : > { %v625_v25 = vsub.f32 1.0, %v624_v23 }
 0x237   : > { %v611_v26 = vmul.f32 %v806_v19, %v610_v24 }
 0x238   : > { %v626_v29 = vmul.f32 %v808_v21, %v625_v25 }
 0x239   : > { %v612_v31 = vadd.f32 %v806_v19, %v611_v26 }
 0x23a   : > { %v627_v33 = vadd.f32 %v808_v21, %v626_v29 }
 0x23b   : > { %v616_v34 = vsel %vm615_vm2, %v806_v19, %v612_v31 }
 0x23c   : > { %v621_v36 = vsel %vm618_vm4, %v620_v32, %v616_v34  ;;  %v631_v37 = vsel %vm630_vm0, %v808_v21, %v627_v33 }
 0x23d   : > { %v636_v38 = vsel %vm633_vm1, %v635_v35, %v631_v37  ;;  %638 = vst [vmem:[%s217_s16] sm:$0xff] %v621_v36 }
 0x23e   : > { %639 = vst [vmem:[%s217_s16 + $0x8] sm:$0xff] %v636_v38 }
 0x23f   : > { %836 = shalt.err (!%p833_p3)
}
 0x240   : > { %742 = dma.vmem_to_hbm [thread:$0]  (%p950_p5), %s655_s17, 256, %s657_s22, %s641_s23  }
 0x241 PF: > { %p748_p4 = scmp.ge.s32.totalorder %s871_s21, 2  ;;  %s668_s10 = sand.u32 1, %s859_s18  }
 0x242   : > { %s669_s11 = scalar_lea.sflag [#allocation4], %s668_s10 }
 0x243   : > { %p745_p7 = pnand %p748_p4, %p954_p6 }
 0x245   : > { %p746_p8 = pneg %p745_p7 }
 0x247   : > { %854 = dma.done.wait (%p746_p8), %s669_s11, 256  }
 0x248   : > { %856 = vsyncadd (%p746_p8), %s669_s11, 4294967040  ;;  %p15_p9 = scmp.ge.s32.totalorder %s937_s24, 4   ;;  %s1121_s18 = smov %s863_s19 }
 0x249   : > { %s1122_s19 = smov %s867_s20  ;;  %s1123_s20 = smov %s948_s27 }
 0x24a   : > { %s1124_s21 = smov %s937_s24  ;;  %17 = sbr.rel (!%p15_p9) target bundleno = 3 (0x3), region = 75 }
 0x24f   :  { %675 = vsyncpa [#allocation4], 1 }
 0x250   :  { %677 = vsyncpa [#allocation4 + $0x1], 1 }

</bundles_post_ra>
